<compile_context>
chip_gen: v7x
topology: tpu7x:2x2x1
jax: 0.10.0
libtpu: 0.0.40
codegen_flags: <defaults>
</compile_context>

<pallas_src>
import math

import numpy as np
import jax
import jax.numpy as jnp
from jax import lax
from jax.experimental import pallas as pl
from jax.experimental.pallas import tpu as pltpu

LN_EPS = 1e-5

# Scoped-VMEM budget safe on every generation (v7x only has 64 MiB physical).
VMEM_LIMIT_BYTES = 48 * 1024 * 1024


def _cparams(dims):
    return pltpu.CompilerParams(dimension_semantics=dims,
                                vmem_limit_bytes=VMEM_LIMIT_BYTES)


def _pick_tile(dim, tile):
    """Requested tile if it divides `dim`, otherwise fall back to the full dim."""
    return tile if (tile <= dim and dim % tile == 0) else dim


# ----------------------------- shared math helpers -----------------------------
def _layernorm(x, gamma, beta):
    mu = jnp.mean(x, axis=-1, keepdims=True)
    var = jnp.mean(jnp.square(x - mu), axis=-1, keepdims=True)
    return (x - mu) * lax.rsqrt(var + LN_EPS) * gamma + beta


def _gelu_exact(x):
    # nn.GELU() default = exact erf formulation (f32 math).
    return 0.5 * x * (1.0 + lax.erf(x * 0.7071067811865476))


# ----------------------------- Pallas kernels -----------------------------
def attn_block_kernel(x_ref, g_ref, b_ref,
                      wq_ref, wk_ref, wv_ref, bq_ref, bk_ref, bv_ref,
                      wout_ref, bout_ref, o_ref, h_ref, acc_ref):
    """Fused LN1 + per-head QKV + causal softmax attention + out-proj + residual.

    grid = (batch, head); head axis is "arbitrary" (reduction into acc_ref).
      x:    (1,T,E) f32           wq/wk/wv: (1,E,Dh) bf16    bq/bk/bv: (1,1,Dh) f32
      wout: (1,Dh,E) bf16         bout: (1,E) f32            o: (1,T,E) f32
      h_ref:  (T,E) bf16 scratch (LN1 output, computed once per batch)
      acc_ref:(T,E) f32  scratch (residual + sum over heads of ctx @ Wout_h)
    """
    h_idx = pl.program_id(1)

    @pl.when(h_idx == 0)
    def _():
        h_ref[...] = _layernorm(x_ref[0], g_ref[0], b_ref[0]).astype(jnp.bfloat16)
        acc_ref[...] = x_ref[0] + bout_ref[0]                 # residual + out bias

    h = h_ref[...]                                            # (T, E) bf16
    q = jnp.dot(h, wq_ref[0], preferred_element_type=jnp.float32) + bq_ref[0, 0]
    k = jnp.dot(h, wk_ref[0], preferred_element_type=jnp.float32) + bk_ref[0, 0]
    v = jnp.dot(h, wv_ref[0], preferred_element_type=jnp.float32) + bv_ref[0, 0]

    T, Dh = q.shape
    s = jnp.dot(q, k.T, preferred_element_type=jnp.float32) * (1.0 / math.sqrt(Dh))
    row = lax.broadcasted_iota(jnp.int32, (T, T), 0)
    col = lax.broadcasted_iota(jnp.int32, (T, T), 1)
    s = jnp.where(col > row, jnp.float32(-1e30), s)           # causal mask
    s = s - jnp.max(s, axis=-1, keepdims=True)
    p = jnp.exp(s)
    p = p * pl.reciprocal(jnp.sum(p, axis=-1, keepdims=True), approx=True)
    ctx = jnp.dot(p, v, preferred_element_type=jnp.float32)   # (T, Dh)

    acc_ref[...] += jnp.dot(ctx.astype(jnp.bfloat16), wout_ref[0],
                            preferred_element_type=jnp.float32)

    @pl.when(h_idx == pl.num_programs(1) - 1)
    def _():
        o_ref[0] = acc_ref[...]


def mlp_block_kernel(x_ref, g_ref, b_ref, wfc_ref, bfc_ref, wproj_ref, bproj_ref,
                     o_ref, h_ref, acc_ref):
    """Fused LN2 + c_fc tile + GELU + c_proj tile + residual.

    grid = (batch, 4E-tile); tile axis is "arbitrary" (reduction into acc_ref).
      x: (1,T,E) f32   wfc: (E,tf) bf16   bfc: (1,tf) f32
      wproj: (tf,E) bf16   bproj: (1,E) f32   o: (1,T,E) f32
      h_ref:  (T,E) bf16 scratch (LN2 output, computed once per batch)
      acc_ref:(T,E) f32  scratch (residual + sum over 4E tiles)
    """
    n = pl.program_id(1)

    @pl.when(n == 0)
    def _():
        h_ref[...] = _layernorm(x_ref[0], g_ref[0], b_ref[0]).astype(jnp.bfloat16)
        acc_ref[...] = x_ref[0] + bproj_ref[0]                # residual + proj bias

    z = jnp.dot(h_ref[...], wfc_ref[...],
                preferred_element_type=jnp.float32) + bfc_ref[0]
    g = _gelu_exact(z)
    acc_ref[...] += jnp.dot(g.astype(jnp.bfloat16), wproj_ref[...],
                            preferred_element_type=jnp.float32)

    @pl.when(n == pl.num_programs(1) - 1)
    def _():
        o_ref[0] = acc_ref[...]


def decode_kernel(x_ref, g_ref, b_ref, w_ref, bias_ref, o_ref):
    """Final LayerNorm on the (already-sliced) last token + vocab-tiled decoder."""
    xn = _layernorm(x_ref[0], g_ref[0], b_ref[0])             # (1, E) f32
    o_ref[0] = jnp.dot(xn.astype(jnp.bfloat16), w_ref[...],
                       preferred_element_type=jnp.float32) + bias_ref[0]


# ----------------------------- pallas_call wrappers -----------------------------
def run_block(x, blk, n_heads, tile_f=512):
    """One TransformerBlock: LN1 -> causal MHA -> residual, LN2 -> MLP -> residual."""
    B, T, E = x.shape
    H = n_heads
    Dh = E // H
    F = 4 * E
    tf = _pick_tile(F, tile_f)          # MLP 4E tile (production: sweep 256-1024)

    # Head-major repack of the attention weights (bf16).  In production these
    # would be packed once at load time rather than per call.
    w_qkv = blk["w_qkv"]                # (E, 3E), columns = [q | k | v]
    b_qkv = blk["b_qkv"][0]             # (3E,)
    wq_h = w_qkv[:, 0 * E:1 * E].reshape(E, H, Dh).transpose(1, 0, 2)   # (H, E, Dh)
    wk_h = w_qkv[:, 1 * E:2 * E].reshape(E, H, Dh).transpose(1, 0, 2)
    wv_h = w_qkv[:, 2 * E:3 * E].reshape(E, H, Dh).transpose(1, 0, 2)
    bq_h = b_qkv[0 * E:1 * E].reshape(H, 1, Dh)                          # (H, 1, Dh)
    bk_h = b_qkv[1 * E:2 * E].reshape(H, 1, Dh)
    bv_h = b_qkv[2 * E:3 * E].reshape(H, 1, Dh)
    w_out_h = blk["w_out"].reshape(H, Dh, E)                             # (H, Dh, E)

    head_w_spec = pl.BlockSpec((1, E, Dh), lambda b, h: (h, 0, 0))
    head_b_spec = pl.BlockSpec((1, 1, Dh), lambda b, h: (h, 0, 0))
    vec_spec = pl.BlockSpec((1, E), lambda b, h: (0, 0))

    # ---- fused LN1 + per-head attention + out-proj + residual ----
    x = pl.pallas_call(
        attn_block_kernel,
        out_shape=jax.ShapeDtypeStruct((B, T, E), jnp.float32),
        grid=(B, H),
        in_specs=[
            pl.BlockSpec((1, T, E), lambda b, h: (b, 0, 0)),   # x
            vec_spec, vec_spec,                                # ln1 gamma / beta
            head_w_spec, head_w_spec, head_w_spec,             # Wq / Wk / Wv
            head_b_spec, head_b_spec, head_b_spec,             # bq / bk / bv
            pl.BlockSpec((1, Dh, E), lambda b, h: (h, 0, 0)),  # Wout (per head)
            vec_spec,                                          # bout
        ],
        out_specs=pl.BlockSpec((1, T, E), lambda b, h: (b, 0, 0)),
        scratch_shapes=[pltpu.VMEM((T, E), jnp.bfloat16),
                        pltpu.VMEM((T, E), jnp.float32)],
        compiler_params=_cparams(("parallel", "arbitrary")),
    )(x, blk["ln1_g"], blk["ln1_b"], wq_h, wk_h, wv_h, bq_h, bk_h, bv_h,
      w_out_h, blk["b_out"])

    # ---- fused LN2 + c_fc + GELU + c_proj + residual (4E streamed) ----
    x = pl.pallas_call(
        mlp_block_kernel,
        out_shape=jax.ShapeDtypeStruct((B, T, E), jnp.float32),
        grid=(B, F // tf),
        in_specs=[
            pl.BlockSpec((1, T, E), lambda b, n: (b, 0, 0)),   # x
            pl.BlockSpec((1, E), lambda b, n: (0, 0)),         # ln2 gamma
            pl.BlockSpec((1, E), lambda b, n: (0, 0)),         # ln2 beta
            pl.BlockSpec((E, tf), lambda b, n: (0, n)),        # w_fc column tile
            pl.BlockSpec((1, tf), lambda b, n: (0, n)),        # b_fc tile
            pl.BlockSpec((tf, E), lambda b, n: (n, 0)),        # w_proj row tile
            pl.BlockSpec((1, E), lambda b, n: (0, 0)),         # b_proj
        ],
        out_specs=pl.BlockSpec((1, T, E), lambda b, n: (b, 0, 0)),
        scratch_shapes=[pltpu.VMEM((T, E), jnp.bfloat16),
                        pltpu.VMEM((T, E), jnp.float32)],
        compiler_params=_cparams(("parallel", "arbitrary")),
    )(x, blk["ln2_g"], blk["ln2_b"], blk["w_fc"], blk["b_fc"],
      blk["w_proj"], blk["b_proj"])

    return x


def run_final(x, lnf_g, lnf_b, dec_w, dec_b, tile_v=512):
    """Final LayerNorm + tied-weight decoder on the LAST position, vocab-tiled."""
    B, T, E = x.shape
    V = dec_w.shape[1]
    tv = _pick_tile(V, tile_v)          # lane-dense vocab tile (multiple of 128)
    x_last = x[:, T - 1:T, :]           # only the last token enters the kernel
    return pl.pallas_call(
        decode_kernel,
        out_shape=jax.ShapeDtypeStruct((B, 1, V), jnp.float32),
        grid=(B, V // tv),
        in_specs=[
            pl.BlockSpec((1, 1, E), lambda b, v: (b, 0, 0)),
            pl.BlockSpec((1, E), lambda b, v: (0, 0)),
            pl.BlockSpec((1, E), lambda b, v: (0, 0)),
            pl.BlockSpec((E, tv), lambda b, v: (0, v)),
            pl.BlockSpec((1, tv), lambda b, v: (0, v)),
        ],
        out_specs=pl.BlockSpec((1, 1, tv), lambda b, v: (b, 0, v)),
        compiler_params=_cparams(("parallel", "parallel")),
    )(x_last, lnf_g, lnf_b, dec_w, dec_b)


def transformer_forward(sequences, params, n_heads, tile_f=512, tile_v=512):
    """targets=None path of Transformer.forward -> logits of shape (B, 1, vocab)."""
    B, T = sequences.shape
    # Embedding gather + positional add (glue, plain JAX).  Dropout = identity (eval).
    tok_emb = jnp.take(params["vocab_embed"], sequences, axis=0)        # (B, T, E)
    pos_emb = params["pos_embed"][:T]                                   # (T, E)
    x = tok_emb + pos_emb[None, :, :]
    for blk in params["blocks"]:
        x = run_block(x, blk, n_heads, tile_f=tile_f)
    return run_final(x, params["lnf_g"], params["lnf_b"],
                     params["dec_w"], params["dec_b"], tile_v=tile_v)
    # TODO(synk): loss branch (cross-entropy with optional mask / sep_token) and
    # generate() sampling loop (top-k + multinomial) are not kernelized here.


# ----------------------------- pure-JAX reference -----------------------------
def reference_forward(sequences, params, n_heads):
    B, T = sequences.shape
    E = params["vocab_embed"].shape[1]
    Dh = E // n_heads
    bf16 = jnp.bfloat16
    x = jnp.take(params["vocab_embed"], sequences, axis=0) + params["pos_embed"][:T][None]
    row = np.arange(T)[:, None]
    col = np.arange(T)[None, :]
    causal = jnp.asarray(col > row)
    for blk in params["blocks"]:
        h = _layernorm(x, blk["ln1_g"][0], blk["ln1_b"][0])
        qkv = jnp.dot(h.astype(bf16), blk["w_qkv"],
                      preferred_element_type=jnp.float32) + blk["b_qkv"][0]
        q, k, v = jnp.split(qkv, 3, axis=-1)
        q = q.reshape(B, T, n_heads, Dh).transpose(0, 2, 1, 3)
        k = k.reshape(B, T, n_heads, Dh).transpose(0, 2, 1, 3)
        v = v.reshape(B, T, n_heads, Dh).transpose(0, 2, 1, 3)
        s = jnp.einsum("bhqd,bhkd->bhqk", q, k) / np.sqrt(Dh)
        s = jnp.where(causal, -1e30, s)
        p = jax.nn.softmax(s, axis=-1)
        a = jnp.einsum("bhqk,bhkd->bhqd", p, v).transpose(0, 2, 1, 3).reshape(B, T, E)
        a = jnp.dot(a.astype(bf16), blk["w_out"],
                    preferred_element_type=jnp.float32) + blk["b_out"][0]
        x = x + a
        h2 = _layernorm(x, blk["ln2_g"][0], blk["ln2_b"][0])
        g = _gelu_exact(jnp.dot(h2.astype(bf16), blk["w_fc"],
                                preferred_element_type=jnp.float32) + blk["b_fc"][0])
        m = jnp.dot(g.astype(bf16), blk["w_proj"],
                    preferred_element_type=jnp.float32) + blk["b_proj"][0]
        x = x + m
    xn = _layernorm(x[:, -1:, :], params["lnf_g"][0], params["lnf_b"][0])
    return jnp.dot(xn.astype(bf16), params["dec_w"],
                   preferred_element_type=jnp.float32) + params["dec_b"][0]


# ----------------------------- deterministic init -----------------------------
def init_params(key, vocab, layers, n_heads, E, ctx):
    std = 0.02
    proj_std = 0.02 / np.sqrt(2 * layers)
    keys = jax.random.split(key, 2 + layers * 4)
    ki = iter(keys)

    def nrm(k, shape, s):
        return jax.random.normal(k, shape, jnp.float32) * s

    vocab_embed = nrm(next(ki), (vocab, E), std)
    pos_embed = nrm(next(ki), (ctx, E), std)

    bf16 = jnp.bfloat16
    blocks = []
    for _ in range(layers):
        k1, k2, k3, k4 = next(ki), next(ki), next(ki), next(ki)
        blocks.append({
            "ln1_g": jnp.ones((1, E), jnp.float32), "ln1_b": jnp.zeros((1, E), jnp.float32),
            "w_qkv": nrm(k1, (E, 3 * E), std).astype(bf16),
            "b_qkv": jnp.zeros((1, 3 * E), jnp.float32),
            "w_out": nrm(k2, (E, E), std).astype(bf16),
            "b_out": jnp.zeros((1, E), jnp.float32),
            "ln2_g": jnp.ones((1, E), jnp.float32), "ln2_b": jnp.zeros((1, E), jnp.float32),
            "w_fc": nrm(k3, (E, 4 * E), std).astype(bf16),
            "b_fc": jnp.zeros((1, 4 * E), jnp.float32),
            "w_proj": nrm(k4, (4 * E, E), proj_std).astype(bf16),
            "b_proj": jnp.zeros((1, E), jnp.float32),
        })

    return {
        "vocab_embed": vocab_embed,          # f32 for the embedding gather
        "pos_embed": pos_embed,
        "blocks": blocks,
        "lnf_g": jnp.ones((1, E), jnp.float32), "lnf_b": jnp.zeros((1, E), jnp.float32),
        "dec_w": vocab_embed.T.astype(bf16),  # weight tying: decoder.weight = vocab_embed.weight
        "dec_b": jnp.zeros((1, vocab), jnp.float32),
    }


# ----------------------------- main -----------------------------
if __name__ == "__main__":
    B, T = 2, 16
    VOCAB, LAYERS, HEADS, E, CTX = 512, 2, 4, 128, 32

    key = jax.random.PRNGKey(0)
    k_param, k_seq = jax.random.split(key)
    params = init_params(k_param, VOCAB, LAYERS, HEADS, E, CTX)
    sequences = jax.random.randint(k_seq, (B, T), 0, VOCAB, dtype=jnp.int32)

    logits = transformer_forward(sequences, params, HEADS)   # (B, 1, VOCAB)
    logits = jax.block_until_ready(logits)

    ref = reference_forward(sequences, params, HEADS)
    # bf16 matmuls + approx-EUP softmax reciprocal -> slightly looser tolerance.
    np.testing.assert_allclose(np.asarray(logits, dtype=np.float32),
                               np.asarray(ref, dtype=np.float32),
                               rtol=1e-2, atol=1e-2)

    print("KERNEL_OK")
</pallas_src>

<mosaic_0001>
module attributes {stable_mosaic.version = 11 : i64} {
  func.func @attn_block_kernel(%arg0: i32, %arg1: i32, %arg2: memref<1x16x128xf32, #tpu.memory_space<vmem>>, %arg3: memref<1x128xf32, #tpu.memory_space<vmem>>, %arg4: memref<1x128xf32, #tpu.memory_space<vmem>>, %arg5: memref<1x128x32xbf16, #tpu.memory_space<vmem>>, %arg6: memref<1x128x32xbf16, #tpu.memory_space<vmem>>, %arg7: memref<1x128x32xbf16, #tpu.memory_space<vmem>>, %arg8: memref<1x1x32xf32, #tpu.memory_space<vmem>>, %arg9: memref<1x1x32xf32, #tpu.memory_space<vmem>>, %arg10: memref<1x1x32xf32, #tpu.memory_space<vmem>>, %arg11: memref<1x32x128xbf16, #tpu.memory_space<vmem>>, %arg12: memref<1x128xf32, #tpu.memory_space<vmem>>, %arg13: memref<1x16x128xf32, #tpu.memory_space<vmem>>, %arg14: memref<16x128xbf16, #tpu.memory_space<vmem>>, %arg15: memref<16x128xf32, #tpu.memory_space<vmem>>) attributes {dimension_semantics = [#tpu.dimension_semantics<parallel>, #tpu.dimension_semantics<arbitrary>], iteration_bounds = array<i64: 2, 4>, scalar_prefetch = 0 : i64, scratch_operands = 2 : i64, tpu.core_type = #tpu.core_type<tc>, window_params = [{transform_indices = @transform_0, window_bounds = array<i64: 1, 16, 128>}, {pipeline_mode = #tpu.pipeline_mode<synchronous>, transform_indices = @transform_1, window_bounds = array<i64: 1, 128>}, {pipeline_mode = #tpu.pipeline_mode<synchronous>, transform_indices = @transform_2, window_bounds = array<i64: 1, 128>}, {transform_indices = @transform_3, window_bounds = array<i64: 1, 128, 32>}, {transform_indices = @transform_4, window_bounds = array<i64: 1, 128, 32>}, {transform_indices = @transform_5, window_bounds = array<i64: 1, 128, 32>}, {transform_indices = @transform_6, window_bounds = array<i64: 1, 1, 32>}, {transform_indices = @transform_7, window_bounds = array<i64: 1, 1, 32>}, {transform_indices = @transform_8, window_bounds = array<i64: 1, 1, 32>}, {transform_indices = @transform_9, window_bounds = array<i64: 1, 32, 128>}, {pipeline_mode = #tpu.pipeline_mode<synchronous>, transform_indices = @transform_10, window_bounds = array<i64: 1, 128>}, {transform_indices = @transform_11, window_bounds = array<i64: 1, 16, 128>}]} {
    %c0_i32 = arith.constant 0 : i32
    %0 = arith.cmpi eq, %arg1, %c0_i32 : i32
    %1 = arith.extui %0 : i1 to i32
    %c0_i32_0 = arith.constant 0 : i32
    %2 = arith.cmpi ne, %1, %c0_i32_0 : i32
    scf.if %2 {
      %c0_37 = arith.constant 0 : index
      %c0_38 = arith.constant 0 : index
      %c0_39 = arith.constant 0 : index
      %58 = vector.load %arg2[%c0_37, %c0_38, %c0_39] : memref<1x16x128xf32, #tpu.memory_space<vmem>>, vector<1x16x128xf32>
      %59 = vector.shape_cast %58 : vector<1x16x128xf32> to vector<16x128xf32>
      %c0_40 = arith.constant 0 : index
      %c0_41 = arith.constant 0 : index
      %60 = vector.load %arg3[%c0_40, %c0_41] : memref<1x128xf32, #tpu.memory_space<vmem>>, vector<1x128xf32>
      %61 = vector.shape_cast %60 : vector<1x128xf32> to vector<128xf32>
      %c0_42 = arith.constant 0 : index
      %c0_43 = arith.constant 0 : index
      %62 = vector.load %arg4[%c0_42, %c0_43] : memref<1x128xf32, #tpu.memory_space<vmem>>, vector<1x128xf32>
      %63 = vector.shape_cast %62 : vector<1x128xf32> to vector<128xf32>
      %cst_44 = arith.constant dense<0.000000e+00> : vector<16xf32>
      %64 = vector.multi_reduction <add>, %59, %cst_44 [1] : vector<16x128xf32> to vector<16xf32>
      %65 = vector.shape_cast %64 : vector<16xf32> to vector<16x1xf32>
      %cst_45 = arith.constant 1.280000e+02 : f32
      %66 = vector.broadcast %cst_45 : f32 to vector<16x1xf32>
      %67 = arith.divf %65, %66 : vector<16x1xf32>
      %68 = vector.broadcast %67 : vector<16x1xf32> to vector<16x128xf32>
      %69 = arith.subf %59, %68 : vector<16x128xf32>
      %70 = arith.mulf %69, %69 : vector<16x128xf32>
      %cst_46 = arith.constant dense<0.000000e+00> : vector<16xf32>
      %71 = vector.multi_reduction <add>, %70, %cst_46 [1] : vector<16x128xf32> to vector<16xf32>
      %72 = vector.shape_cast %71 : vector<16xf32> to vector<16x1xf32>
      %cst_47 = arith.constant 1.280000e+02 : f32
      %73 = vector.broadcast %cst_47 : f32 to vector<16x1xf32>
      %74 = arith.divf %72, %73 : vector<16x1xf32>
      %75 = vector.broadcast %67 : vector<16x1xf32> to vector<16x128xf32>
      %76 = arith.subf %59, %75 : vector<16x128xf32>
      %cst_48 = arith.constant 9.99999974E-6 : f32
      %77 = vector.broadcast %cst_48 : f32 to vector<16x1xf32>
      %78 = arith.addf %74, %77 : vector<16x1xf32>
      %79 = math.rsqrt %78 : vector<16x1xf32>
      %80 = vector.broadcast %79 : vector<16x1xf32> to vector<16x128xf32>
      %81 = arith.mulf %76, %80 : vector<16x128xf32>
      %82 = vector.shape_cast %61 : vector<128xf32> to vector<1x128xf32>
      %83 = vector.broadcast %82 : vector<1x128xf32> to vector<16x128xf32>
      %84 = arith.mulf %81, %83 : vector<16x128xf32>
      %85 = vector.shape_cast %63 : vector<128xf32> to vector<1x128xf32>
      %86 = vector.broadcast %85 : vector<1x128xf32> to vector<16x128xf32>
      %87 = arith.addf %84, %86 : vector<16x128xf32>
      %88 = arith.truncf %87 : vector<16x128xf32> to vector<16x128xbf16>
      %c0_49 = arith.constant 0 : index
      %c0_50 = arith.constant 0 : index
      %89 = vector.load %arg14[%c0_49, %c0_50] : memref<16x128xbf16, #tpu.memory_space<vmem>>, vector<16x128xbf16>
      tpu.vector_store %arg14[%c0_49, %c0_50], %88 {strides = array<i32>} : memref<16x128xbf16, #tpu.memory_space<vmem>>, vector<16x128xbf16>,
      %c0_51 = arith.constant 0 : index
      %c0_52 = arith.constant 0 : index
      %c0_53 = arith.constant 0 : index
      %90 = vector.load %arg2[%c0_51, %c0_52, %c0_53] : memref<1x16x128xf32, #tpu.memory_space<vmem>>, vector<1x16x128xf32>
      %91 = vector.shape_cast %90 : vector<1x16x128xf32> to vector<16x128xf32>
      %c0_54 = arith.constant 0 : index
      %c0_55 = arith.constant 0 : index
      %92 = vector.load %arg12[%c0_54, %c0_55] : memref<1x128xf32, #tpu.memory_space<vmem>>, vector<1x128xf32>
      %93 = vector.shape_cast %92 : vector<1x128xf32> to vector<128xf32>
      %94 = vector.shape_cast %93 : vector<128xf32> to vector<1x128xf32>
      %95 = vector.broadcast %94 : vector<1x128xf32> to vector<16x128xf32>
      %96 = arith.addf %91, %95 : vector<16x128xf32>
      %c0_56 = arith.constant 0 : index
      %c0_57 = arith.constant 0 : index
      %97 = vector.load %arg15[%c0_56, %c0_57] : memref<16x128xf32, #tpu.memory_space<vmem>>, vector<16x128xf32>
      tpu.vector_store %arg15[%c0_56, %c0_57], %96 {strides = array<i32>} : memref<16x128xf32, #tpu.memory_space<vmem>>, vector<16x128xf32>,
    } else {
    }
    %c0 = arith.constant 0 : index
    %c0_1 = arith.constant 0 : index
    %3 = vector.load %arg14[%c0, %c0_1] : memref<16x128xbf16, #tpu.memory_space<vmem>>, vector<16x128xbf16>
    %c0_2 = arith.constant 0 : index
    %c0_3 = arith.constant 0 : index
    %c0_4 = arith.constant 0 : index
    %4 = vector.load %arg5[%c0_2, %c0_3, %c0_4] : memref<1x128x32xbf16, #tpu.memory_space<vmem>>, vector<1x128x32xbf16>
    %5 = vector.shape_cast %4 : vector<1x128x32xbf16> to vector<128x32xbf16>
    %cst = arith.constant dense<0.000000e+00> : vector<16x32xf32>
    %6 = tpu.matmul %3, %5, %cst {dimension_numbers = #tpu.dot_dimension_numbers<[1], [0], [0], [1], [0, 0, 1, 1], [], []>} : vector<16x128xbf16>, vector<128x32xbf16>, vector<16x32xf32> -> vector<16x32xf32>
    %c0_5 = arith.constant 0 : index
    %c0_6 = arith.constant 0 : index
    %c0_7 = arith.constant 0 : index
    %7 = vector.load %arg8[%c0_5, %c0_6, %c0_7] : memref<1x1x32xf32, #tpu.memory_space<vmem>>, vector<1x1x32xf32>
    %8 = vector.shape_cast %7 : vector<1x1x32xf32> to vector<32xf32>
    %9 = vector.shape_cast %8 : vector<32xf32> to vector<1x32xf32>
    %10 = vector.broadcast %9 : vector<1x32xf32> to vector<16x32xf32>
    %11 = arith.addf %6, %10 : vector<16x32xf32>
    %c0_8 = arith.constant 0 : index
    %c0_9 = arith.constant 0 : index
    %c0_10 = arith.constant 0 : index
    %12 = vector.load %arg6[%c0_8, %c0_9, %c0_10] : memref<1x128x32xbf16, #tpu.memory_space<vmem>>, vector<1x128x32xbf16>
    %13 = vector.shape_cast %12 : vector<1x128x32xbf16> to vector<128x32xbf16>
    %cst_11 = arith.constant dense<0.000000e+00> : vector<16x32xf32>
    %14 = tpu.matmul %3, %13, %cst_11 {dimension_numbers = #tpu.dot_dimension_numbers<[1], [0], [0], [1], [0, 0, 1, 1], [], []>} : vector<16x128xbf16>, vector<128x32xbf16>, vector<16x32xf32> -> vector<16x32xf32>
    %c0_12 = arith.constant 0 : index
    %c0_13 = arith.constant 0 : index
    %c0_14 = arith.constant 0 : index
    %15 = vector.load %arg9[%c0_12, %c0_13, %c0_14] : memref<1x1x32xf32, #tpu.memory_space<vmem>>, vector<1x1x32xf32>
    %16 = vector.shape_cast %15 : vector<1x1x32xf32> to vector<32xf32>
    %17 = vector.shape_cast %16 : vector<32xf32> to vector<1x32xf32>
    %18 = vector.broadcast %17 : vector<1x32xf32> to vector<16x32xf32>
    %19 = arith.addf %14, %18 : vector<16x32xf32>
    %c0_15 = arith.constant 0 : index
    %c0_16 = arith.constant 0 : index
    %c0_17 = arith.constant 0 : index
    %20 = vector.load %arg7[%c0_15, %c0_16, %c0_17] : memref<1x128x32xbf16, #tpu.memory_space<vmem>>, vector<1x128x32xbf16>
    %21 = vector.shape_cast %20 : vector<1x128x32xbf16> to vector<128x32xbf16>
    %cst_18 = arith.constant dense<0.000000e+00> : vector<16x32xf32>
    %22 = tpu.matmul %3, %21, %cst_18 {dimension_numbers = #tpu.dot_dimension_numbers<[1], [0], [0], [1], [0, 0, 1, 1], [], []>} : vector<16x128xbf16>, vector<128x32xbf16>, vector<16x32xf32> -> vector<16x32xf32>
    %c0_19 = arith.constant 0 : index
    %c0_20 = arith.constant 0 : index
    %c0_21 = arith.constant 0 : index
    %23 = vector.load %arg10[%c0_19, %c0_20, %c0_21] : memref<1x1x32xf32, #tpu.memory_space<vmem>>, vector<1x1x32xf32>
    %24 = vector.shape_cast %23 : vector<1x1x32xf32> to vector<32xf32>
    %25 = vector.shape_cast %24 : vector<32xf32> to vector<1x32xf32>
    %26 = vector.broadcast %25 : vector<1x32xf32> to vector<16x32xf32>
    %27 = arith.addf %22, %26 : vector<16x32xf32>
    %28 = tpu.transpose %19, [1, 0] : vector<16x32xf32> -> vector<32x16xf32>
    %cst_22 = arith.constant dense<0.000000e+00> : vector<16x16xf32>
    %29 = tpu.matmul %11, %28, %cst_22 {dimension_numbers = #tpu.dot_dimension_numbers<[1], [0], [0], [1], [0, 0, 1, 1], [], []>} : vector<16x32xf32>, vector<32x16xf32>, vector<16x16xf32> -> vector<16x16xf32>
    %cst_23 = arith.constant 0.176776692 : f32
    %30 = vector.broadcast %cst_23 : f32 to vector<16x16xf32>
    %31 = arith.mulf %29, %30 : vector<16x16xf32>
    %32 = tpu.iota {dimensions = array<i32: 0>} : vector<16x16xi32>
    %33 = tpu.iota {dimensions = array<i32: 1>} : vector<16x16xi32>
    %34 = arith.cmpi sgt, %33, %32 : vector<16x16xi32>
    %cst_24 = arith.constant -1.000000e+30 : f32
    %35 = vector.broadcast %cst_24 : f32 to vector<16x16xf32>
    %36 = arith.select %34, %35, %31 : vector<16x16xi1>, vector<16x16xf32>
    %cst_25 = arith.constant dense<0xFF800000> : vector<16xf32>
    %37 = vector.multi_reduction <maximumf>, %36, %cst_25 [1] : vector<16x16xf32> to vector<16xf32>
    %38 = vector.shape_cast %37 : vector<16xf32> to vector<16x1xf32>
    %39 = vector.broadcast %38 : vector<16x1xf32> to vector<16x16xf32>
    %40 = arith.subf %36, %39 : vector<16x16xf32>
    %41 = math.exp %40 : vector<16x16xf32>
    %cst_26 = arith.constant dense<0.000000e+00> : vector<16xf32>
    %42 = vector.multi_reduction <add>, %41, %cst_26 [1] : vector<16x16xf32> to vector<16xf32>
    %43 = vector.shape_cast %42 : vector<16xf32> to vector<16x1xf32>
    %44 = tpu.reciprocal %43 {approx = true} : vector<16x1xf32> -> vector<16x1xf32>
    %45 = vector.broadcast %44 : vector<16x1xf32> to vector<16x16xf32>
    %46 = arith.mulf %41, %45 : vector<16x16xf32>
    %cst_27 = arith.constant dense<0.000000e+00> : vector<16x32xf32>
    %47 = tpu.matmul %46, %27, %cst_27 {dimension_numbers = #tpu.dot_dimension_numbers<[1], [0], [0], [1], [0, 0, 1, 1], [], []>} : vector<16x16xf32>, vector<16x32xf32>, vector<16x32xf32> -> vector<16x32xf32>
    %c0_28 = arith.constant 0 : index
    %c0_29 = arith.constant 0 : index
    %48 = vector.load %arg15[%c0_28, %c0_29] : memref<16x128xf32, #tpu.memory_space<vmem>>, vector<16x128xf32>
    %49 = arith.truncf %47 : vector<16x32xf32> to vector<16x32xbf16>
    %c0_30 = arith.constant 0 : index
    %c0_31 = arith.constant 0 : index
    %c0_32 = arith.constant 0 : index
    %50 = vector.load %arg11[%c0_30, %c0_31, %c0_32] : memref<1x32x128xbf16, #tpu.memory_space<vmem>>, vector<1x32x128xbf16>
    %51 = vector.shape_cast %50 : vector<1x32x128xbf16> to vector<32x128xbf16>
    %cst_33 = arith.constant dense<0.000000e+00> : vector<16x128xf32>
    %52 = tpu.matmul %49, %51, %cst_33 {dimension_numbers = #tpu.dot_dimension_numbers<[1], [0], [0], [1], [0, 0, 1, 1], [], []>} : vector<16x32xbf16>, vector<32x128xbf16>, vector<16x128xf32> -> vector<16x128xf32>
    %53 = arith.addf %48, %52 : vector<16x128xf32>
    %c0_34 = arith.constant 0 : index
    %c0_35 = arith.constant 0 : index
    %54 = vector.load %arg15[%c0_34, %c0_35] : memref<16x128xf32, #tpu.memory_space<vmem>>, vector<16x128xf32>
    tpu.vector_store %arg15[%c0_34, %c0_35], %53 {strides = array<i32>} : memref<16x128xf32, #tpu.memory_space<vmem>>, vector<16x128xf32>,
    %c3_i32 = arith.constant 3 : i32
    %55 = arith.cmpi eq, %arg1, %c3_i32 : i32
    %56 = arith.extui %55 : i1 to i32
    %c0_i32_36 = arith.constant 0 : i32
    %57 = arith.cmpi ne, %56, %c0_i32_36 : i32
    scf.if %57 {
      %c0_37 = arith.constant 0 : index
      %c0_38 = arith.constant 0 : index
      %58 = vector.load %arg15[%c0_37, %c0_38] : memref<16x128xf32, #tpu.memory_space<vmem>>, vector<16x128xf32>
      %c0_39 = arith.constant 0 : index
      %c0_40 = arith.constant 0 : index
      %c0_41 = arith.constant 0 : index
      %59 = vector.load %arg13[%c0_39, %c0_40, %c0_41] : memref<1x16x128xf32, #tpu.memory_space<vmem>>, vector<1x16x128xf32>
      %60 = vector.shape_cast %59 : vector<1x16x128xf32> to vector<16x128xf32>
      %61 = vector.shape_cast %58 : vector<16x128xf32> to vector<1x16x128xf32>
      tpu.vector_store %arg13[%c0_39, %c0_40, %c0_41], %61 {strides = array<i32>} : memref<1x16x128xf32, #tpu.memory_space<vmem>>, vector<1x16x128xf32>,
    } else {
    }
    return
  }
  func.func @transform_0(%arg0: i32, %arg1: i32) -> (i32, i32, i32) {
    %c0_i32 = arith.constant 0 : i32
    %c0_i32_0 = arith.constant 0 : i32
    %c0_i32_1 = arith.constant 0 : i32
    return %arg0, %c0_i32, %c0_i32_0 : i32, i32, i32
  }
  func.func @transform_1(%arg0: i32, %arg1: i32) -> (i32, i32) {
    %c0_i32 = arith.constant 0 : i32
    %c0_i32_0 = arith.constant 0 : i32
    %c0_i32_1 = arith.constant 0 : i32
    return %c0_i32, %c0_i32_0 : i32, i32
  }
  func.func @transform_2(%arg0: i32, %arg1: i32) -> (i32, i32) {
    %c0_i32 = arith.constant 0 : i32
    %c0_i32_0 = arith.constant 0 : i32
    %c0_i32_1 = arith.constant 0 : i32
    return %c0_i32, %c0_i32_0 : i32, i32
  }
  func.func @transform_3(%arg0: i32, %arg1: i32) -> (i32, i32, i32) {
    %c0_i32 = arith.constant 0 : i32
    %c0_i32_0 = arith.constant 0 : i32
    %c0_i32_1 = arith.constant 0 : i32
    return %arg1, %c0_i32, %c0_i32_0 : i32, i32, i32
  }
  func.func @transform_4(%arg0: i32, %arg1: i32) -> (i32, i32, i32) {
    %c0_i32 = arith.constant 0 : i32
    %c0_i32_0 = arith.constant 0 : i32
    %c0_i32_1 = arith.constant 0 : i32
    return %arg1, %c0_i32, %c0_i32_0 : i32, i32, i32
  }
  func.func @transform_5(%arg0: i32, %arg1: i32) -> (i32, i32, i32) {
    %c0_i32 = arith.constant 0 : i32
    %c0_i32_0 = arith.constant 0 : i32
    %c0_i32_1 = arith.constant 0 : i32
    return %arg1, %c0_i32, %c0_i32_0 : i32, i32, i32
  }
  func.func @transform_6(%arg0: i32, %arg1: i32) -> (i32, i32, i32) {
    %c0_i32 = arith.constant 0 : i32
    %c0_i32_0 = arith.constant 0 : i32
    %c0_i32_1 = arith.constant 0 : i32
    return %arg1, %c0_i32, %c0_i32_0 : i32, i32, i32
  }
  func.func @transform_7(%arg0: i32, %arg1: i32) -> (i32, i32, i32) {
    %c0_i32 = arith.constant 0 : i32
    %c0_i32_0 = arith.constant 0 : i32
    %c0_i32_1 = arith.constant 0 : i32
    return %arg1, %c0_i32, %c0_i32_0 : i32, i32, i32
  }
  func.func @transform_8(%arg0: i32, %arg1: i32) -> (i32, i32, i32) {
    %c0_i32 = arith.constant 0 : i32
    %c0_i32_0 = arith.constant 0 : i32
    %c0_i32_1 = arith.constant 0 : i32
    return %arg1, %c0_i32, %c0_i32_0 : i32, i32, i32
  }
  func.func @transform_9(%arg0: i32, %arg1: i32) -> (i32, i32, i32) {
    %c0_i32 = arith.constant 0 : i32
    %c0_i32_0 = arith.constant 0 : i32
    %c0_i32_1 = arith.constant 0 : i32
    return %arg1, %c0_i32, %c0_i32_0 : i32, i32, i32
  }
  func.func @transform_10(%arg0: i32, %arg1: i32) -> (i32, i32) {
    %c0_i32 = arith.constant 0 : i32
    %c0_i32_0 = arith.constant 0 : i32
    %c0_i32_1 = arith.constant 0 : i32
    return %c0_i32, %c0_i32_0 : i32, i32
  }
  func.func @transform_11(%arg0: i32, %arg1: i32) -> (i32, i32, i32) {
    %c0_i32 = arith.constant 0 : i32
    %c0_i32_0 = arith.constant 0 : i32
    %c0_i32_1 = arith.constant 0 : i32
    return %arg0, %c0_i32, %c0_i32_0 : i32, i32, i32
  }
}

</mosaic_0001>

<bundles_post_ra>
// kernel: tpu_custom_call.1
= control target key start
LH: loop header
LB: loop body
LE: loop exit
PB: predicated region body
PF: predicated region fallthrough
CT: control target
= control target key end

     0   :  { %s2110_s0 = inlined_call_operand.vmem [shape: f32[2,16,128], index: 0, kind: input, shape index: {}]   ;;  %s2111_s1 = inlined_call_operand.vmem [shape: f32[1,128], index: 1, kind: input, shape index: {}]   ;;  %s2112_s2 = inlined_call_operand.vmem [shape: f32[1,128], index: 2, kind: input, shape index: {}]   ;;  %s2113_s3 = inlined_call_operand.vmem [shape: bf16[4,128,32], index: 3, kind: input, shape index: {}]   ;;  %s2114_s4 = inlined_call_operand.vmem [shape: bf16[4,128,32], index: 4, kind: input, shape index: {}]   ;;  %s2115_s5 = inlined_call_operand.vmem [shape: bf16[4,128,32], index: 5, kind: input, shape index: {}]   ;;  %s2116_s6 = inlined_call_operand.vmem [shape: f32[4,1,32], index: 6, kind: input, shape index: {}]   ;;  %s2117_s7 = inlined_call_operand.vmem [shape: f32[4,1,32], index: 7, kind: input, shape index: {}]   ;;  %s2118_s8 = inlined_call_operand.vmem [shape: f32[4,1,32], index: 8, kind: input, shape index: {}]   ;;  %s2119_s9 = inlined_call_operand.vmem [shape: bf16[4,32,128], index: 9, kind: input, shape index: {}]   ;;  %s2120_s10 = inlined_call_operand.vmem [shape: f32[1,128], index: 10, kind: input, shape index: {}]   ;;  %s2121_s11 = inlined_call_operand.hbm [shape: f32[2,16,128], index: 11, kind: output, shape index: {}]  }
   0x1   :  { %2136 = sst [smem:[#allocation19_spill]] %s2110_s0 }
   0x2   :  { %2137 = sst [smem:[#allocation20_spill]] %s2113_s3 }
   0x3   :  { %2138 = sst [smem:[#allocation21_spill]] %s2114_s4 }
   0x4   :  { %2139 = sst [smem:[#allocation22_spill]] %s2121_s11 }
   0x5   :  { %16 = vsyncpa [#allocation5], 0 }
   0x6   :  { %18 = vsyncpa [#allocation5 + $0x1], 0  ;;  %s1831_s17 = smov 0   ;;  %s1833_s18 = smov 0  }
   0x7   :  { %s1835_s19 = smov 0   ;;  %s1837_s20 = smov 0  }
   0x8   :  { %s1839_s21 = smov 0   ;;  %s1841_s22 = smov 0  }
   0x9   :  { %s1843_s23 = smov 0   ;;  %s1845_s24 = smov 0  }
   0xa LB: > { %2140 = sst [smem:[#allocation7_spill]] %s1736_s17  ;;  %s1359_s25 = sadd.s32 4294967295, %s1764_s24   ;;  %s1764_s24 = sphi %s1845_s24, %s24_s24   ;;  %s1760_s23 = sphi %s1843_s23, %s2171_s23   ;;  %s1756_s22 = sphi %s1841_s22, %s2170_s22   ;;  %s1752_s21 = sphi %s1839_s21, %s2169_s21   ;;  %s1748_s20 = sphi %s1837_s20, %s2168_s20   ;;  %s1744_s19 = sphi %s1835_s19, %s2167_s19   ;;  %s1740_s18 = sphi %s1833_s18, %s2166_s18   ;;  %s1736_s17 = sphi %s1831_s17, %s2165_s17  }
   0xb   : > { %2141 = sst [smem:[#allocation8_spill]] %s1740_s18  ;;  %s1360_s26 = sadd.s32 4294967294, %s1764_s24  }
   0xc   : > { %2142 = sst [smem:[#allocation9_spill]] %s1744_s19  ;;  %s33_s27 = sadd.s32 1, %s1756_s22 }
   0xd   : > { %2143 = sst [smem:[#allocation10_spill]] %s1752_s21  ;;  %p34_p0 = scmp.ge.s32.totalorder %s33_s27, 4 }
   0xe   : > { %2144 = sst [smem:[#allocation11_spill]] %s1756_s22  ;;  %s36_s28 = sadd.s32 1, %s1760_s23 }
   0xf   : > { %2145 = sst [smem:[#allocation12_spill]] %s1760_s23  ;;  %p324_p1 = scmp.ne.s32.totalorder %s1744_s19, %s1740_s18 }
  0x10   : > { %2146 = sst [smem:[#allocation13_spill]] %s1764_s24  ;;  %p325_p2 = scmp.eq.s32.totalorder %s1359_s25, 7 }
  0x11   : > { %s2173_s27 = smov (%p34_p0, %s33_s27), 0  ;;  %s2175_s28 = smov (!%p34_p0, %s36_s28), %s1760_s23 }
  0x12   : > { %2147 = sst [smem:[#allocation14_spill]] %s2173_s27  ;;  %p1880_p3 = por %p325_p2, %p324_p1 }
  0x13   : > { %p330_p4 = scmp.ne.s32.totalorder %s1740_s18, %s1736_s17  ;;  %p38_p5 = scmp.ge.s32.totalorder %s2175_s28, 2 }
  0x14   : > { %s2148_s29 = scalar_select %p1880_p3, 1, 0 }
  0x15   : > { %p331_p6 = scmp.eq.s32.totalorder %s1360_s26, 7  ;;  %p1363_p7 = scmp.ge.s32.totalorder %s1764_s24, 1 }
  0x16   : > { %2149 = sst [smem:[#allocation15_spill]] %s2148_s29  ;;  %p416_p8 = scmp.lt.s32.totalorder %s1764_s24, 9 }
  0x17   : > { %s2177_s28 = smov (%p38_p5, %s2175_s28), 0  ;;  %p1890_p9 = por %p331_p6, %p330_p4 }
  0x18   : > { %2150 = sst [smem:[#allocation16_spill]] %s2177_s28  ;;  %p417_p10 = pnand %p1363_p7, %p416_p8 }
  0x19   : > { %s2151_s30 = scalar_select %p1890_p9, 1, 0 }
  0x1a   : > { %s311_s12 = ssub.s32 %s1760_s23, %s2177_s28  ;;  %s314_s13 = sadd.s32 1, %s1744_s19 }
  0x1b   : > { %2152 = sst [smem:[#allocation17_spill]] %s2151_s30  ;;  %p312_p11 = scmp.eq.s32.totalorder %s311_s12, 0 }
  0x1c   : > { %420 = sbr.rel (%p417_p10) target bundleno = 1618 (0x652), region = 64  ;;  %s2126_s15 = sand.u32 (!%p417_p10), 1, %s1740_s18  }
  0x1d   : > { %s1898_s14 = scalar_select %p312_p11, %s1744_s19, %s314_s13  }
  0x1e   : > { %p485_p12 = scmp.lt.s32.totalorder (!%p417_p10), %s1752_s21, 1  ;;  %s1364_s16 = sshll.u32 (!%p417_p10), %s2126_s15, 4 }
  0x1f   : > { %2153 = sst [smem:[#allocation18_spill]] %s1898_s14  ;;  %p490_p13 = scmp.lt.s32.totalorder (!%p417_p10), %s1748_s20, 3 }
  0x20   : > { %s2154_s0 = sld [smem:[#allocation19_spill]] (!%p417_p10)  ;;  %s2155_s3 = sld [smem:[#allocation20_spill]] (!%p417_p10) }
  0x21   : > { %s2156_s4 = sld [smem:[#allocation21_spill]] (!%p417_p10)  ;;  %s1946_s11 = scalar_lea.vmem (!%p417_p10), [#allocation4], %s1364_s16 }
  0x22   : > { %p1375_p0 = scmp.ne.s32.totalorder (!%p417_p10), %s1748_s20, 0 }
  0x23   : > { %s486_s25 = scalar_select %p485_p12, %s1752_s21, 1 }
  0x24   : > { %s1907_s26 = scalar_select %p490_p13, %s1748_s20, 3 }
  0x25   : > { %s1421_s12 = sshll.u32 %s486_s25, 4  ;;  %523 = sbr.rel (%p1375_p0) target bundleno = 358 (0x166), region = 68  ;;  %v1378_v10 = vld [vmem:[%s2120_s10] ss:$0 sm:$0xff] (!%p1375_p0) }
  0x26   : > { %s489_s27 = scalar_lea.vmem %s2154_s0, %s1421_s12  ;;  %s1422_s23 = sshll.u32 %s1907_s26, 6  ;;  %v1376_v21 = vld [vmem:[%s2111_s1] ss:$0 sm:$0xff] (!%p1375_p0) }
  0x27   : > { %s1916_s19 = scalar_lea.vmem %s2155_s3, %s1422_s23  ;;  %s1921_s17 = scalar_lea.vmem %s2156_s4, %s1422_s23  ;;  %v524_v0 = vld [vmem:[%s489_s27] sm:$0xff] (!%p1375_p0)  ;;  %v525_v1 = vld [vmem:[%s489_s27 + $0x8] sm:$0xff] (!%p1375_p0) }
  0x28   : > { %s1926_s29 = scalar_lea.vmem %s2115_s5, %s1422_s23  ;;  %s507_s28 = scalar_lea.vmem %s2116_s6, %s1907_s26  ;;  %528 = vadd.xlane.f32.xlu0 (!%p1375_p0), %v524_v0  ;;  %v578_v11 = vadd.f32 (!%p1375_p0), %v1378_v10, %v524_v0  ;;  %v579_v12 = vadd.f32 (!%p1375_p0), %v1378_v10, %v525_v1  ;;  %v1377_v25 = vld [vmem:[%s2112_s2] ss:$0 sm:$0xff] (!%p1375_p0) }
  0x29   : > { %s510_s22 = scalar_lea.vmem %s2117_s7, %s1907_s26  ;;  %s513_s3 = scalar_lea.vmem %s2118_s8, %s1907_s26 }
  0x2a   : > { %s1425_s30 = sshll.u32 %s1907_s26, 4  ;;  %580 = vst [vmem:[#allocation3] sm:$0xff] (!%p1375_p0), %v578_v11  ;;  %581 = vst [vmem:[#allocation3 + $0x8] sm:$0xff] (!%p1375_p0), %v579_v12 }
  0x2b   : > { %s1944_s21 = scalar_lea.vmem %s2119_s9, %s1425_s30 }
  0x2c   : > { %530 = vadd.xlane.f32.xlu0 %v525_v1 }
  0xb5   : > { %v529_v2 = vpop.xlane.xlu0 %528 }
  0xb6   : > { %v533_v3 = vmul.f32 0.0078125, %v529_v2 }
  0xb8   : > { %v535_v4 = vsub.f32 %v524_v0, %v533_v3 }
  0xb9   : > { %v531_v5 = vpop.xlane.xlu0 %530 }
  0xba   : > { %v534_v6 = vmul.f32 0.0078125, %v531_v5  ;;  %v537_v7 = vmul.f32 %v535_v4, %v535_v4 }
  0xbc   : > { %v536_v8 = vsub.f32 %v525_v1, %v534_v6  ;;  %539 = vadd.xlane.f32.xlu1 %v537_v7 }
  0xbe   : > { %v538_v9 = vmul.f32 %v536_v8, %v536_v8 }
  0xc0   : > { %541 = vadd.xlane.f32.xlu1 %v538_v9 }
 0x149   : > { %v540_v13 = vpop.xlane.xlu1 %539 }
 0x14a   : > { %v543_v14 = vmul.f32 0.0078125, %v540_v13 }
 0x14c   : > { %v545_v15 = vadd.f32 1e-05, %v543_v14 }
 0x14d   : > { %v542_v16 = vpop.xlane.xlu1 %541 }
 0x14e   : > { %1632 = vrsqrt.f32 %v545_v15  ;;  %v544_v17 = vmul.f32 0.0078125, %v542_v16 }
 0x150   : > { %v546_v18 = vadd.f32 1e-05, %v544_v17 }
 0x152   : > { %1634 = vrsqrt.f32 %v546_v18 }
 0x158   : > { %v1633_v19 = vpop.eup %1632 }
 0x159   : > { %v549_v20 = vmul.f32 %v1633_v19, %v535_v4 }
 0x15b   : > { %v557_v23 = vmul.f32 %v1376_v21, %v549_v20 }
 0x15c   : > { %v1635_v22 = vpop.eup %1634 }
 0x15d   : > { %v550_v24 = vmul.f32 %v1635_v22, %v536_v8  ;;  %v565_v27 = vadd.f32 %v1377_v25, %v557_v23 }
 0x15f   : > { %v558_v26 = vmul.f32 %v1376_v21, %v550_v24 }
 0x161   : > { %v566_v28 = vadd.f32 %v1377_v25, %v558_v26 }
 0x163   : > { %v567_v29 = vpack.c.bf16 %v566_v28, %v565_v27 }
 0x165   : > { %568 = vst [vmem:[#allocation2] sm:$0xff] %v567_v29 }
 0x166 PF: > { %v1636_v30 = vld [vmem:[%s1921_s17] sm:$0xff]   ;;  %v1766_v31 = vmov 0.0   ;;  %v1637_v32 = vld [vmem:[%s1921_s17 + $0x8] sm:$0xff]   ;;  %vm1767_vm0 = vmmov 0   ;;  %v1639_v35 = vld [vmem:[%s1921_s17 + $0x10] sm:$0xff]   ;;  %vm919_vm1 = vcmask 261120   ;;  %v1009_v7 = vlaneseq }
 0x167   : > { %1485 = vmatprep.subr.bf16.mxu1 %v1766_v31  ;;  %1465 = vmatprep.subr.bf16.mxu0 %v1766_v31  ;;  %v1638_v33 = vld [vmem:[%s1916_s19] sm:$0xff]   ;;  %v1640_v34 = vld [vmem:[%s1916_s19 + $0x8] sm:$0xff]   ;;  %v1642_v36 = vld [vmem:[%s1916_s19 + $0x10] sm:$0xff]   ;;  %vm1018_vm4 = vcmask 130048   ;;  %p1415_p1 = scmp.ne.s32.totalorder %s1748_s20, 3 }
 0x168   : > { %1486 = vmatpush3.bf16.msra.mxu1 %v1636_v30  ;;  %1501 = vmatprep.mubr.msk.bf16.mxu1 %vm1767_vm0, %v1766_v31  ;;  %v1641_v37 = vld [vmem:[%s1921_s17 + $0x18] sm:$0xff]   ;;  %v1643_v39 = vld [vmem:[%s1921_s17 + $0x20] sm:$0xff]   ;;  %v1645_v40 = vld [vmem:[%s1921_s17 + $0x28] sm:$0xff]   ;;  %v1010_v8 = vshrl.u32 %v1009_v7, 7  ;;  %v1013_v9 = vand.u32 127, %v1009_v7 }
 0x169   : > { %1487 = vmatprep.subr.bf16.mxu1 %v1766_v31  ;;  %1481 = vmatprep.mubr.msk.bf16.mxu0 %vm1767_vm0, %v1766_v31  ;;  %v1644_v38 = vld [vmem:[%s1916_s19 + $0x18] sm:$0xff]   ;;  %v1646_v41 = vld [vmem:[%s1916_s19 + $0x20] sm:$0xff]   ;;  %v1648_v42 = vld [vmem:[%s1916_s19 + $0x28] sm:$0xff]  }
 0x16a   : > { %1466 = vmatpush3.bf16.msra.mxu0 %v1638_v33  ;;  %v1647_v43 = vld [vmem:[%s1921_s17 + $0x30] sm:$0xff]   ;;  %v1649_v45 = vld [vmem:[%s1921_s17 + $0x38] sm:$0xff]   ;;  %v1388_v48 = vld [vmem:[%s510_s22] ss:$0 sm:$0xff]  ;;  %v1011_v10 = vadd.s32 8, %v1010_v8  ;;  %vm1014_vm3 = vcmp.gt.s32.totalorder %v1013_v9, %v1010_v8 }
 0x16b   : > { %1467 = vmatprep.subr.bf16.mxu0 %v1766_v31  ;;  %v1650_v44 = vld [vmem:[%s1916_s19 + $0x30] sm:$0xff]   ;;  %v1651_v46 = vld [vmem:[%s1916_s19 + $0x38] sm:$0xff]   ;;  %v1379_v50 = vld [vmem:[%s507_s28] ss:$0 sm:$0xff] }
 0x16c   : > { %1488 = vmatpush3.bf16.msra.mxu1 %v1637_v32  ;;  %v582_v47 = vld [vmem:[#allocation2] sm:$0xff]  ;;  %vm1548_vm2 = vmpackc.low %vm919_vm1, %vm919_vm1  ;;  %v1653_v0 = vld [vmem:[%s1926_s29 + $0x8] sm:$0xff]   ;;  %vm1015_vm5 = vcmp.gt.s32.totalorder %v1013_v9, %v1011_v10 }
 0x16d   : > { %1489 = vmatprep.subr.bf16.mxu1 %v1766_v31  ;;  %v1652_v63 = vld [vmem:[%s1926_s29] sm:$0xff]   ;;  %v1654_v1 = vld [vmem:[%s1926_s29 + $0x10] sm:$0xff]   ;;  %v1655_v2 = vld [vmem:[%s1926_s29 + $0x18] sm:$0xff]  }
 0x16e   : > { %1468 = vmatpush3.bf16.msra.mxu0 %v1640_v34  ;;  %v1656_v3 = vld [vmem:[%s1926_s29 + $0x20] sm:$0xff]   ;;  %v1657_v4 = vld [vmem:[%s1926_s29 + $0x28] sm:$0xff]   ;;  %v1658_v5 = vld [vmem:[%s1926_s29 + $0x30] sm:$0xff]  }
 0x16f   : > { %1469 = vmatprep.subr.bf16.mxu0 %v1766_v31  ;;  %v1659_v6 = vld [vmem:[%s1926_s29 + $0x38] sm:$0xff]   ;;  %v1397_v32 = vld [vmem:[%s513_s3] ss:$0 sm:$0xff] }
 0x170   : > { %1490 = vmatpush3.bf16.msra.mxu1 %v1639_v35 }
 0x171   : > { %1491 = vmatprep.subr.bf16.mxu1 %v1766_v31 }
 0x172   : > { %1470 = vmatpush3.bf16.msra.mxu0 %v1642_v36 }
 0x173   : > { %1471 = vmatprep.subr.bf16.mxu0 %v1766_v31 }
 0x174   : > { %1492 = vmatpush3.bf16.msra.mxu1 %v1641_v37 }
 0x175   : > { %1493 = vmatprep.subr.bf16.mxu1 %v1766_v31 }
 0x176   : > { %1472 = vmatpush3.bf16.msra.mxu0 %v1644_v38 }
 0x177   : > { %1473 = vmatprep.subr.bf16.mxu0 %v1766_v31 }
 0x178   : > { %1494 = vmatpush3.bf16.msra.mxu1 %v1643_v39 }
 0x179   : > { %1495 = vmatprep.subr.bf16.mxu1 %v1766_v31 }
 0x17a   : > { %1474 = vmatpush3.bf16.msra.mxu0 %v1646_v41 }
 0x17b   : > { %1475 = vmatprep.subr.bf16.mxu0 %v1766_v31 }
 0x17c   : > { %1496 = vmatpush3.bf16.msra.mxu1 %v1645_v40 }
 0x17d   : > { %1497 = vmatprep.subr.bf16.mxu1 %v1766_v31 }
 0x17e   : > { %1476 = vmatpush3.bf16.msra.mxu0 %v1648_v42 }
 0x17f   : > { %1477 = vmatprep.subr.bf16.mxu0 %v1766_v31 }
 0x180   : > { %1498 = vmatpush3.bf16.msra.mxu1 %v1647_v43  ;;  %v1660_v43 = vld [vmem:[%s1944_s21] sm:$0xff]  }
 0x181   : > { %1499 = vmatprep.subr.bf16.mxu1 %v1766_v31 }
 0x182   : > { %1478 = vmatpush3.bf16.msra.mxu0 %v1650_v44 }
 0x183   : > { %1479 = vmatprep.subr.bf16.mxu0 %v1766_v31 }
 0x184   : > { %1500 = vmatpush3.bf16.msra.mxu1 %v1649_v45  ;;  %v1661_v45 = vld [vmem:[%s1944_s21 + $0x8] sm:$0xff]  }
 0x186   : > { %1480 = vmatpush3.bf16.msra.mxu0 %v1651_v46 }
 0x187   : > { %1502 = vmatmul.mubr.bf16.vlgmr.msra.gmra.mrb[0].mxu1 %v582_v47  ;;  %1505 = vmatprep.subr.bf16.mxu0 %v1766_v31 }
 0x189   : > { %1482 = vmatmul.mubr.bf16.vlgmr.msra.gmra.mrb[0].mxu0 %v582_v47 }
 0x18a   : > { %1521 = vmatprep.mubr.msk.bf16.mxu0 %vm1767_vm0, %v1766_v31  ;;  %1506 = vmatpush3.bf16.msra.mxu0 %v1652_v63 }
 0x18b   : > { %1507 = vmatprep.subr.bf16.mxu0 %v1766_v31 }
 0x18e   : > { %1508 = vmatpush3.bf16.msra.mxu0 %v1653_v0 }
 0x18f   : > { %1509 = vmatprep.subr.bf16.mxu0 %v1766_v31 }
 0x192   : > { %1510 = vmatpush3.bf16.msra.mxu0 %v1654_v1 }
 0x193   : > { %1511 = vmatprep.subr.bf16.mxu0 %v1766_v31 }
 0x196   : > { %1512 = vmatpush3.bf16.msra.mxu0 %v1655_v2 }
 0x197   : > { %1513 = vmatprep.subr.bf16.mxu0 %v1766_v31 }
 0x19a   : > { %1514 = vmatpush3.bf16.msra.mxu0 %v1656_v3 }
 0x19b   : > { %1515 = vmatprep.subr.bf16.mxu0 %v1766_v31 }
 0x19e   : > { %1516 = vmatpush3.bf16.msra.mxu0 %v1657_v4 }
 0x19f   : > { %1517 = vmatprep.subr.bf16.mxu0 %v1766_v31 }
 0x1a2   : > { %1518 = vmatpush3.bf16.msra.mxu0 %v1658_v5 }
 0x1a3   : > { %1519 = vmatprep.subr.bf16.mxu0 %v1766_v31 }
 0x1a6   : > { %1520 = vmatpush3.bf16.msra.mxu0 %v1659_v6 }
 0x1a9   : > { %1522 = vmatmul.mubr.bf16.vlgmr.msra.gmra.mrb[4].mxu0 %v582_v47 }
 0x25a   : > { %v800_v49 = vpop.f32.mrb[0].mxu1 }
 0x25b   : > { %v1503_v51 = vpop.f32.mrb[1].mxu1  ;;  %v801_v54 = vadd.f32 %v1388_v48, %v800_v49  ;;  %v1122_v49 = vld [vmem:[#allocation3] sm:$0xff] }
 0x25c   : > { %v803_v52 = vpop.f32.mrb[2].mxu1  ;;  %v688_v53 = vpop.f32.mrb[0].mxu0  ;;  %v1123_v51 = vld [vmem:[#allocation3 + $0x8] sm:$0xff] }
 0x25d   : > { %v804_v55 = vadd.f32 %v1388_v48, %v803_v52  ;;  %v1504_v56 = vpop.f32.mrb[3].mxu1  ;;  %v689_v57 = vadd.f32 %v1379_v50, %v688_v53  ;;  %v1483_v58 = vpop.f32.mrb[1].mxu0 }
 0x25e   : > { %v691_v59 = vpop.f32.mrb[2].mxu0 }
 0x25f   : > { %v1547_v60 = vpack.c.bf16 %v804_v55, %v801_v54  ;;  %v1484_v61 = vpop.f32.mrb[3].mxu0  ;;  %1529 = vmatprep.mubr.msk.f32.mxu1 %vm919_vm1, %v689_v57  ;;  %v692_v62 = vadd.f32 %v1379_v50, %v691_v59 }
 0x261   : > { %1549 = vmatprep.subr.msk.bf16.mxu1 %vm1548_vm2, %v1547_v60 }
 0x262   : > { %1552 = vmatpush3.bf16.xpose.msk.msra.mxu1 %vm1548_vm2, %v1547_v60 }
 0x269   : > { %1530 = vmatmul.mubr.msk.f32.vlgmr.msra.gmra.mrb[4].mxu1 %vm919_vm1, %v692_v62 }
 0x27c   : > { %v912_v29 = vpop.f32.mrb[4].mxu0 }
 0x27d   : > { %v1523_v30 = vpop.f32.mrb[5].mxu0  ;;  %v913_v34 = vadd.f32 %v1397_v32, %v912_v29 }
 0x27e   : > { %v915_v33 = vpop.f32.mrb[6].mxu0 }
 0x27f   : > { %v916_v35 = vadd.f32 %v1397_v32, %v915_v33  ;;  %v1524_v36 = vpop.f32.mrb[7].mxu0 }
 0x281   : > { %v1553_v37 = vpack.c.bf16 %v916_v35, %v913_v34 }
 0x283   : > { %1554 = vmatprep.subr.bf16.mxu1 %v1553_v37 }
 0x284   : > { %1556 = vmatpush3.bf16.msra.mxu1 %v1553_v37 }
 0x285   : > { %1539 = vmatprep.subr.bf16.mxu1 %v1766_v31 }
 0x33c   : > { %v1531_v11 = vpop.f32.mrb[4].mxu1 }
 0x33d   : > { %v998_v12 = vpop.f32.mrb[5].mxu1  ;;  %v1008_v13 = vmul.f32 0.17677669, %v1531_v11 }
 0x33e   : > { %v1007_v14 = vmul.f32 0.17677669, %v998_v12 }
 0x33f   : > { %v1017_v17 = vsel %vm1015_vm5, -1e+30, %v1008_v13 }
 0x340   : > { %v1016_v15 = vsel %vm1014_vm3, -1e+30, %v1007_v14  ;;  %v1022_v18 = vsel %vm1018_vm4, %v1017_v17, -inf }
 0x341   : > { %v1019_v16 = vsel %vm1018_vm4, %v1016_v15, -inf }
 0x342   : > { %1020 = vmax.xlane.f32.xlu0 %v1019_v16 }
 0x346   : > { %1023 = vmax.xlane.f32.xlu0 %v1022_v18 }
 0x3cf   : > { %v1021_v19 = vpop.xlane.xlu0 %1020 }
 0x3d0   : > { %v1025_v20 = vsub.f32 %v1016_v15, %v1021_v19 }
 0x3d2   : > { %v1027_v21 = vmul.f32 1.442695, %v1025_v20 }
 0x3d3   : > { %v1024_v22 = vpop.xlane.xlu0 %1023 }
 0x3d4   : > { %1662 = vpow2.f32 %v1027_v21  ;;  %v1026_v23 = vsub.f32 %v1017_v17, %v1024_v22 }
 0x3d6   : > { %v1029_v24 = vmul.f32 1.442695, %v1026_v23 }
 0x3d8   : > { %1664 = vpow2.f32 %v1029_v24 }
 0x3de   : > { %v1663_v25 = vpop.eup %1662 }
 0x3df   : > { %v1031_v26 = vsel %vm1018_vm4, %v1663_v25, 0.0 }
 0x3e0   : > { %1032 = vadd.xlane.f32.xlu1 %v1031_v26 }
 0x3e2   : > { %v1665_v27 = vpop.eup %1664 }
 0x3e3   : > { %v1034_v28 = vsel %vm1018_vm4, %v1665_v27, 0.0 }
 0x3e4   : > { %1035 = vadd.xlane.f32.xlu1 %v1034_v28 }
 0x46d   : > { %v1033_v38 = vpop.xlane.xlu1 %1032 }
 0x46e   : > { %1666 = vrcp.f32 %v1033_v38 }
 0x471   : > { %v1036_v39 = vpop.xlane.xlu1 %1035 }
 0x472   : > { %1668 = vrcp.f32 %v1036_v39 }
 0x478   : > { %v1667_v40 = vpop.eup %1666 }
 0x479   : > { %v1039_v41 = vmul.f32 %v1667_v40, %v1663_v25 }
 0x47b   : > { %1536 = vmatprep.mubr.msk.f32.mxu1 %vm1018_vm4, %v1039_v41 }
 0x47c   : > { %v1669_v42 = vpop.eup %1668 }
 0x47d   : > { %v1040_v44 = vmul.f32 %v1669_v42, %v1665_v27 }
 0x47f   : > { %1537 = vmatmul.mubr.msk.f32.vlgmr.msra.gmra.mrb[6].mxu1 %vm1018_vm4, %v1040_v44 }
 0x480   : > { %1540 = vmatpush3.bf16.msra.mxu1 %v1660_v43  ;;  %1543 = vmatprep.mubr.msk.bf16.mxu1 %vm1767_vm0, %v1766_v31 }
 0x481   : > { %1541 = vmatprep.subr.bf16.mxu1 %v1766_v31 }
 0x484   : > { %1542 = vmatpush3.bf16.msra.mxu1 %v1661_v45 }
 0x552   : > { %v1538_v46 = vpop.f32.mrb[6].mxu1 }
 0x553   : > { %v1113_v47 = vpop.f32.mrb[7].mxu1 }
 0x554   : > { %v1124_v48 = vpack.c.bf16 %v1538_v46, %v1113_v47 }
 0x556   : > { %1544 = vmatmul.mubr.msk.bf16.vlgmr.msra.gmra.mrb[8].mxu1 %vm919_vm1, %v1124_v48 }
 0x628   : > { %1192 = sbr.rel (%p1415_p1) target bundleno = 1591 (0x637), region = 72 }
 0x629   : > { %v1178_v50 = vpop.f32.mrb[8].mxu1 }
 0x62a   : > { %v1185_v52 = vadd.f32 %v1178_v50, %v1122_v49  ;;  %v1545_v53 = vpop.f32.mrb[9].mxu1 }
 0x62b   : > { %v1181_v54 = vpop.f32.mrb[10].mxu1 }
 0x62c   : > { %1187 = vst [vmem:[#allocation3] sm:$0xff] %v1185_v52  ;;  %v1186_v55 = vadd.f32 %v1181_v54, %v1123_v51  ;;  %v1546_v56 = vpop.f32.mrb[11].mxu1 }
 0x62e   : > { %1188 = vst [vmem:[#allocation3 + $0x8] sm:$0xff] %v1186_v55 }
 0x633   : > { %v1193_v31 = vld [vmem:[#allocation3] sm:$0xff] }
 0x634   : > { %1195 = vst [vmem:[%s1946_s11] sm:$0xff] %v1193_v31 }
 0x635   : > { %v1194_v57 = vld [vmem:[#allocation3 + $0x8] sm:$0xff] }
 0x636   : > { %1196 = vst [vmem:[%s1946_s11 + $0x8] sm:$0xff] %v1194_v57 }
 0x637 PF: > { %s2157_s3 = sld [smem:[#allocation10_spill]]  ;;  %s2160_s14 = sld [smem:[#allocation22_spill]] }
 0x638   : > { %s2158_s21 = sld [smem:[#allocation8_spill]]  ;;  %s1211_s15 = sshll.u32 %s1946_s11, 4  ;;  %s2054_s15 = int_to_ptr.vmem [resolvable:$true] %s1211_s15 }
 0x639   : > { %s1670_s4 = scalar_lea.vmem %s2054_s15, 256  ;;  %s1768_s18 = smov [#allocation4]  }
 0x63a   : > { %p1671_p2 = scmp.ne.s32.totalorder %s2054_s15, %s1670_s4  ;;  %s1674_s23 = sshll.u32 %s1768_s18, 4  ;;  %s1675_s23 = int_to_ptr.vmem [resolvable:$false] %s1674_s23 }
 0x63b   : > { %s1676_s24 = scalar_lea.vmem %s1675_s23, 512  ;;  %p1677_p6 = scmp.lt.s32.totalorder %s2054_s15, %s1675_s23 }
 0x63c   : > { %p1672_p4 = pnand %p1671_p2, %p1880_p3  ;;  %p1678_p7 = scmp.lt.s32.totalorder %s1676_s24, %s1670_s4 }
 0x63d   : > { %s1426_s12 = sshll.u32 %s2157_s3, 8 }
 0x63e   : > { %s2051_s30 = scalar_lea.hbm %s2160_s14, %s1426_s12  ;;  %s2161_s20 = sand.u32 1, %s2158_s21  }
 0x63f   : > { %s2058_s0 = scalar_lea.sflag [#allocation5], %s2161_s20  ;;  %p1673_p5 = pneg %p1672_p4 }
 0x640   : > { %p1679_p8 = por %p1678_p7, %p1677_p6 }
 0x642   : > { %p1680_p10 = pnand %p1679_p8, %p1673_p5 }
 0x644   : > { %1683 = shalt.err (!%p1680_p10)
}
 0x645   : > { %s1684_s11 = scalar_lea.hbm %s2051_s30, 256  ;;  %s1688_s25 = scalar_lea.hbm %s2160_s14, 512 }
 0x646   : > { %p1685_p11 = scmp.ne.s32.totalorder %s2051_s30, %s1684_s11  ;;  %p1689_p0 = scmp.lt.u32.totalorder %s2051_s30, %s2160_s14 }
 0x647   : > { %p1690_p1 = scmp.lt.u32.totalorder %s1688_s25, %s1684_s11  ;;  %p1692_p4 = scmp.lt.u32.totalorder %s1684_s11, %s2051_s30 }
 0x648   : > { %p1686_p12 = pnand %p1685_p11, %p1880_p3 }
 0x649   : > { %p1691_p2 = por %p1690_p1, %p1689_p0 }
 0x64a   : > { %p1687_p13 = pneg %p1686_p12 }
 0x64b   : > { %p1693_p5 = por %p1692_p4, %p1691_p2 }
 0x64d   : > { %p1694_p6 = pnand %p1693_p5, %p1687_p13 }
 0x64f   : > { %1697 = shalt.err (!%p1694_p6)
}
 0x650   : > { %s1769_s29 = smov 128   ;;  %s1770_s28 = smov 8  }
 0x651   : > { %1557 = dma.vmem_to_hbm [thread:$0]  (%p1880_p3), %s2054_s15, 256, %s2051_s30, %s2058_s0, %s1769_s29, %s1769_s29, %s1770_s28  }
 0x652 PF: > { %s2162_s3 = sld [smem:[#allocation13_spill]]  ;;  %s2163_s21 = sld [smem:[#allocation7_spill]] }
 0x658   : > { %p1563_p7 = scmp.ge.s32.totalorder %s2162_s3, 2  ;;  %s1226_s13 = sand.u32 1, %s2163_s21  }
 0x659   : > { %s1227_s22 = scalar_lea.sflag [#allocation5], %s1226_s13 }
 0x65a   : > { %p1560_p8 = pnand %p1563_p7, %p1890_p9 }
 0x65c   : > { %1731 = dma.done.wait (!%p1560_p8), %s1227_s22, 256  }
 0x65d   : > { %1733 = vsyncadd (!%p1560_p8), %s1227_s22, 4294967040  ;;  %s24_s24 = sadd.s32 1, %s2162_s3   ;;  %s2165_s17 = sld [smem:[#allocation8_spill]] }
 0x65e   : > { %p21_p10 = scmp.ge.s32.totalorder %s24_s24, 10   ;;  %s2166_s18 = sld [smem:[#allocation9_spill]] }
 0x65f   : > { %s2167_s19 = sld [smem:[#allocation18_spill]]  ;;  %s2168_s20 = sld [smem:[#allocation11_spill]] }
 0x660   : > { %s2169_s21 = sld [smem:[#allocation12_spill]]  ;;  %s2170_s22 = sld [smem:[#allocation14_spill]] }
 0x661   : > { %s2171_s23 = sld [smem:[#allocation16_spill]]  ;;  %23 = sbr.rel (!%p21_p10) target bundleno = 10 (0xa), region = 128 }
 0x668   :  { %1232 = vsyncpa [#allocation5], 1 }
 0x669   :  { %1234 = vsyncpa [#allocation5 + $0x1], 1 }

</bundles_post_ra>
